<compile_context>
chip_gen: v5e
topology: v5e:2x2
jax: 0.10.0
libtpu: 0.0.40
codegen_flags: <defaults>
</compile_context>

<pallas_src>
import math
import functools

import jax
import jax.numpy as jnp
from jax.experimental import pallas as pl
from jax.experimental.pallas import tpu as pltpu


NEG_INF = -1e30  # stand-in for -inf in masked_fill; identical softmax result in f32


def _pick_block(n, candidates=(256, 128)):
    for c in candidates:
        if n % c == 0:
            return c
    return n


# ----------------------------------------------------- projection kernel ---
def _proj_kernel(xq_ref, xk_ref, xv_ref, wq_ref, wk_ref,
                 qh_ref, kh_ref, vh_ref, *, n_head, scale):
    xq = xq_ref[0].astype(jnp.bfloat16)        # (bs, D)
    xk = xk_ref[0].astype(jnp.bfloat16)
    xv = xv_ref[0].astype(jnp.bfloat16)
    wq = wq_ref[...]                           # (D, D) bf16
    wk = wk_ref[...]                           # (D, D) bf16

    # bf16 MXU matmuls with f32 accumulation.
    qp = (jnp.dot(xq, wq, preferred_element_type=jnp.float32) * scale
          ).astype(jnp.bfloat16)                                   # (bs, D), pre-scaled
    kp = jnp.dot(xk, wk, preferred_element_type=jnp.float32).astype(jnp.bfloat16)
    # Faithful to the reference module: V is projected with W_Q.
    vp = jnp.dot(xv, wq, preferred_element_type=jnp.float32).astype(jnp.bfloat16)

    d_k = qp.shape[-1] // n_head
    for h in range(n_head):                    # static; head-major layout write
        sl = slice(h * d_k, (h + 1) * d_k)
        qh_ref[0, h] = qp[:, sl]
        kh_ref[0, h] = kp[:, sl]
        vh_ref[0, h] = vp[:, sl]


def _project_qkv(q, k, v, wq, wk, *, n_head, block_s=None):
    """k/v/q projections done ONCE (not per query tile), head-major outputs."""
    B, S, D = q.shape
    d_k = D // n_head
    scale = 1.0 / math.sqrt(d_k)
    if block_s is None:
        block_s = _pick_block(S, (512, 256, 128))
    assert S % block_s == 0
    grid = (B, S // block_s)

    xmap = lambda b, si: (b, si, 0)
    wmap = lambda b, si: (0, 0)
    hmap = lambda b, si: (b, 0, si, 0)

    kern = functools.partial(_proj_kernel, n_head=n_head, scale=scale)
    out_shape = tuple(jax.ShapeDtypeStruct((B, n_head, S, d_k), jnp.bfloat16)
                      for _ in range(3))
    out_specs = tuple(pl.BlockSpec((1, n_head, block_s, d_k), hmap) for _ in range(3))

    return pl.pallas_call(
        kern,
        out_shape=out_shape,
        grid_spec=pltpu.PrefetchScalarGridSpec(
            num_scalar_prefetch=0,
            grid=grid,
            in_specs=[
                pl.BlockSpec((1, block_s, D), xmap),   # Q rows
                pl.BlockSpec((1, block_s, D), xmap),   # K rows
                pl.BlockSpec((1, block_s, D), xmap),   # V rows
                pl.BlockSpec((D, D), wmap),            # W_Q (bf16)
                pl.BlockSpec((D, D), wmap),            # W_K (bf16)
            ],
            out_specs=out_specs,
        ),
        compiler_params=pltpu.CompilerParams(
            dimension_semantics=("parallel", "parallel"),
            vmem_limit_bytes=32 * 1024 * 1024,
        ),
    )(q, k, v, wq.astype(jnp.bfloat16), wk.astype(jnp.bfloat16))


# ------------------------------------------------------ attention kernel ---
def _attn_kernel(*refs, n_head, has_mask, eps):
    if has_mask:
        (q_ref, qh_ref, kh_ref, vh_ref, mask_ref, wo_ref, g_ref, beta_ref,
         o_ref, m_scr, l_scr, acc_scr, ctx_scr) = refs
    else:
        (q_ref, qh_ref, kh_ref, vh_ref, wo_ref, g_ref, beta_ref,
         o_ref, m_scr, l_scr, acc_scr, ctx_scr) = refs
        mask_ref = None

    ki = pl.program_id(2)

    @pl.when(ki == 0)
    def _init():
        m_scr[...] = jnp.full(m_scr.shape, NEG_INF, dtype=jnp.float32)
        l_scr[...] = jnp.zeros(l_scr.shape, dtype=jnp.float32)
        acc_scr[...] = jnp.zeros(acc_scr.shape, dtype=jnp.float32)

    qh = qh_ref[0]                    # (H, tq, d_k) bf16, pre-scaled by 1/sqrt(d_k)
    kh = kh_ref[0]                    # (H, tk, d_k) bf16
    vh = vh_ref[0]                    # (H, tk, d_k) bf16

    # Batched-over-heads QK^T on the MXU (f32 accumulation).
    s = jnp.einsum('hqd,hkd->hqk', qh, kh,
                   preferred_element_type=jnp.float32)             # (H, tq, tk)
    if mask_ref is not None:
        s = jnp.where(mask_ref[0][None, :, :] == 1, NEG_INF, s)

    # Online (flash) softmax update.
    m_prev = m_scr[...]                                            # (H, tq, 1)
    m_new = jnp.maximum(m_prev, jnp.max(s, axis=-1, keepdims=True))
    alpha = jnp.exp(m_prev - m_new)
    p = jnp.exp(s - m_new)
    # TODO(synk): training-mode dropout on p_attn (nn.Dropout) omitted;
    # eval-mode (identity) semantics implemented.
    l_scr[...] = alpha * l_scr[...] + jnp.sum(p, axis=-1, keepdims=True)
    acc_scr[...] = alpha * acc_scr[...] + jnp.einsum(
        'hqk,hkd->hqd', p.astype(jnp.bfloat16), vh,
        preferred_element_type=jnp.float32)
    m_scr[...] = m_new

    @pl.when(ki == pl.num_programs(2) - 1)
    def _finalize():
        inv_l = pl.reciprocal(l_scr[...], approx=True)             # (H, tq, 1), EUP
        d_k = acc_scr.shape[-1]
        # Assemble per-head context at its lane offset, then ONE full-D matmul.
        for h in range(n_head):
            ctx_scr[:, h * d_k:(h + 1) * d_k] = (
                acc_scr[h] * inv_l[h]).astype(jnp.bfloat16)
        out = jnp.dot(ctx_scr[...], wo_ref[...],
                      preferred_element_type=jnp.float32)          # (tq, D)
        # residual + LayerNorm
        y = out + q_ref[0].astype(jnp.float32)
        mean = jnp.mean(y, axis=-1, keepdims=True)
        var = jnp.mean(jnp.square(y - mean), axis=-1, keepdims=True)
        y = (y - mean) * jax.lax.rsqrt(var + eps)
        o_ref[0] = (y * g_ref[...] + beta_ref[...]).astype(o_ref.dtype)


# ---------------------------------------------------------------- wrapper ---
def multi_headed_attention_forward(q, k, v, params, mask=None, *, n_head,
                                   eps=1e-5, block_q=None, block_kv=None):
    """out = LayerNorm(W_O(attn(W_Q q, W_K k, W_Q v, mask)) + q). q/k/v: (B,S,D)."""
    B, S, D = q.shape
    assert D % n_head == 0
    d_k = D // n_head
    wq, wk, wo = params["w_q"], params["w_k"], params["w_o"]
    gamma = params["gamma"].reshape(1, D).astype(jnp.float32)
    beta = params["beta"].reshape(1, D).astype(jnp.float32)

    # Projections computed once per row (separate small Pallas kernel),
    # delivered head-major so the attention kernel does no transposes.
    qh, kh, vh = _project_qkv(q, k, v, wq, wk, n_head=n_head)

    if block_q is None:
        block_q = _pick_block(S, (256, 128))
    if block_kv is None:
        block_kv = _pick_block(S, (512, 256, 128))
    assert S % block_q == 0 and S % block_kv == 0
    grid = (B, S // block_q, S // block_kv)

    has_mask = mask is not None

    qmap = lambda b, qi, ki: (b, qi, 0)          # raw Q (residual) / output rows
    qhmap = lambda b, qi, ki: (b, 0, qi, 0)      # projected Q heads
    kvmap = lambda b, qi, ki: (b, 0, ki, 0)      # projected K / V heads
    mmap = lambda b, qi, ki: (b, qi, ki)         # mask tile
    wmap = lambda b, qi, ki: (0, 0)              # weights / LayerNorm params

    in_specs = [
        pl.BlockSpec((1, block_q, D), qmap),
        pl.BlockSpec((1, n_head, block_q, d_k), qhmap),
        pl.BlockSpec((1, n_head, block_kv, d_k), kvmap),
        pl.BlockSpec((1, n_head, block_kv, d_k), kvmap),
    ]
    inputs = [q, qh, kh, vh]
    if has_mask:
        in_specs.append(pl.BlockSpec((1, block_q, block_kv), mmap))
        inputs.append(mask.astype(jnp.int8))     # int8 mask: 4x less HBM traffic
    in_specs += [
        pl.BlockSpec((D, D), wmap),              # W_O (bf16)
        pl.BlockSpec((1, D), wmap),              # LayerNorm gamma
        pl.BlockSpec((1, D), wmap),              # LayerNorm beta
    ]
    inputs += [wo.astype(jnp.bfloat16), gamma, beta]

    flops = 4 * B * n_head * S * S * d_k + 2 * B * S * D * D
    transcendentals = B * n_head * S * S
    bytes_accessed = (q.size * q.dtype.itemsize + 3 * qh.size * 2
                      + (mask.size if has_mask else 0)
                      + D * D * 2 + 2 * D * 4 + B * S * D * q.dtype.itemsize)

    kern = functools.partial(_attn_kernel, n_head=n_head, has_mask=has_mask, eps=eps)
    return pl.pallas_call(
        kern,
        out_shape=jax.ShapeDtypeStruct((B, S, D), q.dtype),
        grid_spec=pltpu.PrefetchScalarGridSpec(
            num_scalar_prefetch=0,
            grid=grid,
            in_specs=in_specs,
            out_specs=pl.BlockSpec((1, block_q, D), qmap),
            scratch_shapes=[
                pltpu.VMEM((n_head, block_q, 1), jnp.float32),    # m (running max)
                pltpu.VMEM((n_head, block_q, 1), jnp.float32),    # l (running sum)
                pltpu.VMEM((n_head, block_q, d_k), jnp.float32),  # acc (context)
                pltpu.VMEM((block_q, D), jnp.bfloat16),           # concatenated ctx
            ],
        ),
        compiler_params=pltpu.CompilerParams(
            dimension_semantics=("parallel", "parallel", "arbitrary"),
            vmem_limit_bytes=32 * 1024 * 1024,
        ),
        cost_estimate=pl.CostEstimate(flops=flops,
                                      transcendentals=transcendentals,
                                      bytes_accessed=bytes_accessed),
    )(*inputs)


# -------------------------------------------------------------- reference ---
def mha_reference(q, k, v, params, mask=None, *, n_head, eps=1e-5):
    B, S, D = q.shape
    d_k = D // n_head
    wq, wk, wo = params["w_q"], params["w_k"], params["w_o"]
    gamma, beta = params["gamma"], params["beta"]
    residual = q
    Q = (q @ wq).reshape(B, S, n_head, d_k).transpose(0, 2, 1, 3)
    K = (k @ wk).reshape(B, S, n_head, d_k).transpose(0, 2, 1, 3)
    V = (v @ wq).reshape(B, S, n_head, d_k).transpose(0, 2, 1, 3)   # W_Q quirk
    scores = jnp.einsum("bhqd,bhkd->bhqk", Q, K) / math.sqrt(d_k)
    if mask is not None:
        scores = jnp.where(mask[:, None, :, :] == 1, NEG_INF, scores)
    p = jax.nn.softmax(scores, axis=-1)
    ctx = jnp.einsum("bhqk,bhkd->bhqd", p, V)
    concat = ctx.transpose(0, 2, 1, 3).reshape(B, S, D)
    out = concat @ wo
    y = out + residual
    mean = y.mean(-1, keepdims=True)
    var = ((y - mean) ** 2).mean(-1, keepdims=True)
    return (y - mean) / jnp.sqrt(var + eps) * gamma + beta


def _make_params(key, D):
    k3, k4, k5, k6, k7 = jax.random.split(key, 5)
    return dict(
        w_q=jax.random.normal(k3, (D, D), jnp.float32) / math.sqrt(D),
        w_k=jax.random.normal(k4, (D, D), jnp.float32) / math.sqrt(D),
        w_o=jax.random.normal(k5, (D, D), jnp.float32) / math.sqrt(D),
        gamma=1.0 + 0.1 * jax.random.normal(k6, (D,), jnp.float32),
        beta=0.1 * jax.random.normal(k7, (D,), jnp.float32),
    )


# ------------------------------------------------------------------- main ---
if __name__ == "__main__":
    # bf16 MXU operands (f32 accumulation) -> compare against the f32 reference
    # with a correspondingly relaxed tolerance.
    TOL = dict(atol=5e-2, rtol=5e-2)

    key = jax.random.PRNGKey(0)
    kq, kk, kv, kp, kb = jax.random.split(key, 5)

    # ---- small demo shape (matches the module defaults) ----
    B, S, D, H = 2, 8, 32, 4
    q_in = jax.random.normal(kq, (B, S, D), dtype=jnp.float32)
    k_in = jax.random.normal(kk, (B, S, D), dtype=jnp.float32)
    v_in = jax.random.normal(kv, (B, S, D), dtype=jnp.float32)
    params = _make_params(kp, D)
    # mask==1 marks positions to drop (masked_fill semantics); causal-style.
    cmask = (jnp.arange(S)[None, :] > jnp.arange(S)[:, None]).astype(jnp.int32)
    cmask = jnp.broadcast_to(cmask[None, :, :], (B, S, S))

    out0 = multi_headed_attention_forward(q_in, k_in, v_in, params,
                                          mask=None, n_head=H)
    out0 = jax.block_until_ready(out0)
    with jax.default_matmul_precision("highest"):
        ref0 = mha_reference(q_in, k_in, v_in, params, mask=None, n_head=H)
    assert out0.shape == (B, S, D)
    assert jnp.allclose(out0, ref0, **TOL), "no-mask mismatch"

    out1 = multi_headed_attention_forward(q_in, k_in, v_in, params,
                                          mask=cmask, n_head=H)
    out1 = jax.block_until_ready(out1)
    with jax.default_matmul_precision("highest"):
        ref1 = mha_reference(q_in, k_in, v_in, params, mask=cmask, n_head=H)
    assert jnp.allclose(out1, ref1, **TOL), "masked mismatch"

    # ---- slightly longer sequence to exercise the multi-tile online softmax ----
    B2, S2, D2, H2 = 1, 256, 32, 4
    q2 = jax.random.normal(kb, (B2, S2, D2), dtype=jnp.float32)
    k2 = jax.random.normal(kk, (B2, S2, D2), dtype=jnp.float32)
    v2 = jax.random.normal(kv, (B2, S2, D2), dtype=jnp.float32)
    params2 = _make_params(kp, D2)
    cmask2 = (jnp.arange(S2)[None, :] > jnp.arange(S2)[:, None]).astype(jnp.int32)
    cmask2 = jnp.broadcast_to(cmask2[None, :, :], (B2, S2, S2))

    out2 = multi_headed_attention_forward(q2, k2, v2, params2, mask=cmask2,
                                          n_head=H2, block_q=128, block_kv=128)
    out2 = jax.block_until_ready(out2)
    with jax.default_matmul_precision("highest"):
        ref2 = mha_reference(q2, k2, v2, params2, mask=cmask2, n_head=H2)
    assert jnp.allclose(out2, ref2, **TOL), "tiled (online-softmax) mismatch"

    print("KERNEL_OK")
</pallas_src>

<mosaic_0001>
module attributes {stable_mosaic.version = 11 : i64} {
  func.func @_proj_kernel(%arg0: i32, %arg1: i32, %arg2: memref<1x8x32xf32, #tpu.memory_space<vmem>>, %arg3: memref<1x8x32xf32, #tpu.memory_space<vmem>>, %arg4: memref<1x8x32xf32, #tpu.memory_space<vmem>>, %arg5: memref<32x32xbf16, #tpu.memory_space<vmem>>, %arg6: memref<32x32xbf16, #tpu.memory_space<vmem>>, %arg7: memref<1x4x8x8xbf16, #tpu.memory_space<vmem>>, %arg8: memref<1x4x8x8xbf16, #tpu.memory_space<vmem>>, %arg9: memref<1x4x8x8xbf16, #tpu.memory_space<vmem>>) attributes {dimension_semantics = [#tpu.dimension_semantics<parallel>, #tpu.dimension_semantics<parallel>], iteration_bounds = array<i64: 2, 1>, scalar_prefetch = 0 : i64, scratch_operands = 0 : i64, tpu.core_type = #tpu.core_type<tc>, window_params = [{transform_indices = @transform_0, window_bounds = array<i64: 1, 8, 32>}, {transform_indices = @transform_1, window_bounds = array<i64: 1, 8, 32>}, {transform_indices = @transform_2, window_bounds = array<i64: 1, 8, 32>}, {pipeline_mode = #tpu.pipeline_mode<synchronous>, transform_indices = @transform_3, window_bounds = array<i64: 32, 32>}, {pipeline_mode = #tpu.pipeline_mode<synchronous>, transform_indices = @transform_4, window_bounds = array<i64: 32, 32>}, {transform_indices = @transform_5, window_bounds = array<i64: 1, 4, 8, 8>}, {transform_indices = @transform_6, window_bounds = array<i64: 1, 4, 8, 8>}, {transform_indices = @transform_7, window_bounds = array<i64: 1, 4, 8, 8>}]} {
    %c0 = arith.constant 0 : index
    %c0_0 = arith.constant 0 : index
    %c0_1 = arith.constant 0 : index
    %0 = vector.load %arg2[%c0, %c0_0, %c0_1] : memref<1x8x32xf32, #tpu.memory_space<vmem>>, vector<1x8x32xf32>
    %1 = vector.shape_cast %0 : vector<1x8x32xf32> to vector<8x32xf32>
    %2 = arith.truncf %1 : vector<8x32xf32> to vector<8x32xbf16>
    %c0_2 = arith.constant 0 : index
    %c0_3 = arith.constant 0 : index
    %c0_4 = arith.constant 0 : index
    %3 = vector.load %arg3[%c0_2, %c0_3, %c0_4] : memref<1x8x32xf32, #tpu.memory_space<vmem>>, vector<1x8x32xf32>
    %4 = vector.shape_cast %3 : vector<1x8x32xf32> to vector<8x32xf32>
    %5 = arith.truncf %4 : vector<8x32xf32> to vector<8x32xbf16>
    %c0_5 = arith.constant 0 : index
    %c0_6 = arith.constant 0 : index
    %c0_7 = arith.constant 0 : index
    %6 = vector.load %arg4[%c0_5, %c0_6, %c0_7] : memref<1x8x32xf32, #tpu.memory_space<vmem>>, vector<1x8x32xf32>
    %7 = vector.shape_cast %6 : vector<1x8x32xf32> to vector<8x32xf32>
    %8 = arith.truncf %7 : vector<8x32xf32> to vector<8x32xbf16>
    %c0_8 = arith.constant 0 : index
    %c0_9 = arith.constant 0 : index
    %9 = vector.load %arg5[%c0_8, %c0_9] : memref<32x32xbf16, #tpu.memory_space<vmem>>, vector<32x32xbf16>
    %c0_10 = arith.constant 0 : index
    %c0_11 = arith.constant 0 : index
    %10 = vector.load %arg6[%c0_10, %c0_11] : memref<32x32xbf16, #tpu.memory_space<vmem>>, vector<32x32xbf16>
    %cst = arith.constant dense<0.000000e+00> : vector<8x32xf32>
    %11 = tpu.matmul %2, %9, %cst {dimension_numbers = #tpu.dot_dimension_numbers<[1], [0], [0], [1], [0, 0, 1, 1], [], []>} : vector<8x32xbf16>, vector<32x32xbf16>, vector<8x32xf32> -> vector<8x32xf32>
    %cst_12 = arith.constant 0.353553385 : f32
    %12 = vector.broadcast %cst_12 : f32 to vector<8x32xf32>
    %13 = arith.mulf %11, %12 : vector<8x32xf32>
    %14 = arith.truncf %13 : vector<8x32xf32> to vector<8x32xbf16>
    %cst_13 = arith.constant dense<0.000000e+00> : vector<8x32xf32>
    %15 = tpu.matmul %5, %10, %cst_13 {dimension_numbers = #tpu.dot_dimension_numbers<[1], [0], [0], [1], [0, 0, 1, 1], [], []>} : vector<8x32xbf16>, vector<32x32xbf16>, vector<8x32xf32> -> vector<8x32xf32>
    %16 = arith.truncf %15 : vector<8x32xf32> to vector<8x32xbf16>
    %cst_14 = arith.constant dense<0.000000e+00> : vector<8x32xf32>
    %17 = tpu.matmul %8, %9, %cst_14 {dimension_numbers = #tpu.dot_dimension_numbers<[1], [0], [0], [1], [0, 0, 1, 1], [], []>} : vector<8x32xbf16>, vector<32x32xbf16>, vector<8x32xf32> -> vector<8x32xf32>
    %18 = arith.truncf %17 : vector<8x32xf32> to vector<8x32xbf16>
    %19 = vector.extract_strided_slice %14 {offsets = [0, 0], sizes = [8, 8], strides = [1, 1]} : vector<8x32xbf16> to vector<8x8xbf16>
    %c0_15 = arith.constant 0 : index
    %c0_16 = arith.constant 0 : index
    %c0_17 = arith.constant 0 : index
    %c0_18 = arith.constant 0 : index
    %20 = vector.load %arg7[%c0_15, %c0_16, %c0_17, %c0_18] : memref<1x4x8x8xbf16, #tpu.memory_space<vmem>>, vector<1x1x8x8xbf16>
    %21 = vector.shape_cast %20 : vector<1x1x8x8xbf16> to vector<8x8xbf16>
    %22 = vector.shape_cast %19 : vector<8x8xbf16> to vector<1x1x8x8xbf16>
    tpu.vector_store %arg7[%c0_15, %c0_16, %c0_17, %c0_18], %22 {strides = array<i32>} : memref<1x4x8x8xbf16, #tpu.memory_space<vmem>>, vector<1x1x8x8xbf16>,
    %23 = vector.extract_strided_slice %16 {offsets = [0, 0], sizes = [8, 8], strides = [1, 1]} : vector<8x32xbf16> to vector<8x8xbf16>
    %c0_19 = arith.constant 0 : index
    %c0_20 = arith.constant 0 : index
    %c0_21 = arith.constant 0 : index
    %c0_22 = arith.constant 0 : index
    %24 = vector.load %arg8[%c0_19, %c0_20, %c0_21, %c0_22] : memref<1x4x8x8xbf16, #tpu.memory_space<vmem>>, vector<1x1x8x8xbf16>
    %25 = vector.shape_cast %24 : vector<1x1x8x8xbf16> to vector<8x8xbf16>
    %26 = vector.shape_cast %23 : vector<8x8xbf16> to vector<1x1x8x8xbf16>
    tpu.vector_store %arg8[%c0_19, %c0_20, %c0_21, %c0_22], %26 {strides = array<i32>} : memref<1x4x8x8xbf16, #tpu.memory_space<vmem>>, vector<1x1x8x8xbf16>,
    %27 = vector.extract_strided_slice %18 {offsets = [0, 0], sizes = [8, 8], strides = [1, 1]} : vector<8x32xbf16> to vector<8x8xbf16>
    %c0_23 = arith.constant 0 : index
    %c0_24 = arith.constant 0 : index
    %c0_25 = arith.constant 0 : index
    %c0_26 = arith.constant 0 : index
    %28 = vector.load %arg9[%c0_23, %c0_24, %c0_25, %c0_26] : memref<1x4x8x8xbf16, #tpu.memory_space<vmem>>, vector<1x1x8x8xbf16>
    %29 = vector.shape_cast %28 : vector<1x1x8x8xbf16> to vector<8x8xbf16>
    %30 = vector.shape_cast %27 : vector<8x8xbf16> to vector<1x1x8x8xbf16>
    tpu.vector_store %arg9[%c0_23, %c0_24, %c0_25, %c0_26], %30 {strides = array<i32>} : memref<1x4x8x8xbf16, #tpu.memory_space<vmem>>, vector<1x1x8x8xbf16>,
    %31 = vector.extract_strided_slice %14 {offsets = [0, 8], sizes = [8, 8], strides = [1, 1]} : vector<8x32xbf16> to vector<8x8xbf16>
    %c0_27 = arith.constant 0 : index
    %c1 = arith.constant 1 : index
    %c0_28 = arith.constant 0 : index
    %c0_29 = arith.constant 0 : index
    %32 = vector.load %arg7[%c0_27, %c1, %c0_28, %c0_29] : memref<1x4x8x8xbf16, #tpu.memory_space<vmem>>, vector<1x1x8x8xbf16>
    %33 = vector.shape_cast %32 : vector<1x1x8x8xbf16> to vector<8x8xbf16>
    %34 = vector.shape_cast %31 : vector<8x8xbf16> to vector<1x1x8x8xbf16>
    tpu.vector_store %arg7[%c0_27, %c1, %c0_28, %c0_29], %34 {strides = array<i32>} : memref<1x4x8x8xbf16, #tpu.memory_space<vmem>>, vector<1x1x8x8xbf16>,
    %35 = vector.extract_strided_slice %16 {offsets = [0, 8], sizes = [8, 8], strides = [1, 1]} : vector<8x32xbf16> to vector<8x8xbf16>
    %c0_30 = arith.constant 0 : index
    %c1_31 = arith.constant 1 : index
    %c0_32 = arith.constant 0 : index
    %c0_33 = arith.constant 0 : index
    %36 = vector.load %arg8[%c0_30, %c1_31, %c0_32, %c0_33] : memref<1x4x8x8xbf16, #tpu.memory_space<vmem>>, vector<1x1x8x8xbf16>
    %37 = vector.shape_cast %36 : vector<1x1x8x8xbf16> to vector<8x8xbf16>
    %38 = vector.shape_cast %35 : vector<8x8xbf16> to vector<1x1x8x8xbf16>
    tpu.vector_store %arg8[%c0_30, %c1_31, %c0_32, %c0_33], %38 {strides = array<i32>} : memref<1x4x8x8xbf16, #tpu.memory_space<vmem>>, vector<1x1x8x8xbf16>,
    %39 = vector.extract_strided_slice %18 {offsets = [0, 8], sizes = [8, 8], strides = [1, 1]} : vector<8x32xbf16> to vector<8x8xbf16>
    %c0_34 = arith.constant 0 : index
    %c1_35 = arith.constant 1 : index
    %c0_36 = arith.constant 0 : index
    %c0_37 = arith.constant 0 : index
    %40 = vector.load %arg9[%c0_34, %c1_35, %c0_36, %c0_37] : memref<1x4x8x8xbf16, #tpu.memory_space<vmem>>, vector<1x1x8x8xbf16>
    %41 = vector.shape_cast %40 : vector<1x1x8x8xbf16> to vector<8x8xbf16>
    %42 = vector.shape_cast %39 : vector<8x8xbf16> to vector<1x1x8x8xbf16>
    tpu.vector_store %arg9[%c0_34, %c1_35, %c0_36, %c0_37], %42 {strides = array<i32>} : memref<1x4x8x8xbf16, #tpu.memory_space<vmem>>, vector<1x1x8x8xbf16>,
    %43 = vector.extract_strided_slice %14 {offsets = [0, 16], sizes = [8, 8], strides = [1, 1]} : vector<8x32xbf16> to vector<8x8xbf16>
    %c0_38 = arith.constant 0 : index
    %c2 = arith.constant 2 : index
    %c0_39 = arith.constant 0 : index
    %c0_40 = arith.constant 0 : index
    %44 = vector.load %arg7[%c0_38, %c2, %c0_39, %c0_40] : memref<1x4x8x8xbf16, #tpu.memory_space<vmem>>, vector<1x1x8x8xbf16>
    %45 = vector.shape_cast %44 : vector<1x1x8x8xbf16> to vector<8x8xbf16>
    %46 = vector.shape_cast %43 : vector<8x8xbf16> to vector<1x1x8x8xbf16>
    tpu.vector_store %arg7[%c0_38, %c2, %c0_39, %c0_40], %46 {strides = array<i32>} : memref<1x4x8x8xbf16, #tpu.memory_space<vmem>>, vector<1x1x8x8xbf16>,
    %47 = vector.extract_strided_slice %16 {offsets = [0, 16], sizes = [8, 8], strides = [1, 1]} : vector<8x32xbf16> to vector<8x8xbf16>
    %c0_41 = arith.constant 0 : index
    %c2_42 = arith.constant 2 : index
    %c0_43 = arith.constant 0 : index
    %c0_44 = arith.constant 0 : index
    %48 = vector.load %arg8[%c0_41, %c2_42, %c0_43, %c0_44] : memref<1x4x8x8xbf16, #tpu.memory_space<vmem>>, vector<1x1x8x8xbf16>
    %49 = vector.shape_cast %48 : vector<1x1x8x8xbf16> to vector<8x8xbf16>
    %50 = vector.shape_cast %47 : vector<8x8xbf16> to vector<1x1x8x8xbf16>
    tpu.vector_store %arg8[%c0_41, %c2_42, %c0_43, %c0_44], %50 {strides = array<i32>} : memref<1x4x8x8xbf16, #tpu.memory_space<vmem>>, vector<1x1x8x8xbf16>,
    %51 = vector.extract_strided_slice %18 {offsets = [0, 16], sizes = [8, 8], strides = [1, 1]} : vector<8x32xbf16> to vector<8x8xbf16>
    %c0_45 = arith.constant 0 : index
    %c2_46 = arith.constant 2 : index
    %c0_47 = arith.constant 0 : index
    %c0_48 = arith.constant 0 : index
    %52 = vector.load %arg9[%c0_45, %c2_46, %c0_47, %c0_48] : memref<1x4x8x8xbf16, #tpu.memory_space<vmem>>, vector<1x1x8x8xbf16>
    %53 = vector.shape_cast %52 : vector<1x1x8x8xbf16> to vector<8x8xbf16>
    %54 = vector.shape_cast %51 : vector<8x8xbf16> to vector<1x1x8x8xbf16>
    tpu.vector_store %arg9[%c0_45, %c2_46, %c0_47, %c0_48], %54 {strides = array<i32>} : memref<1x4x8x8xbf16, #tpu.memory_space<vmem>>, vector<1x1x8x8xbf16>,
    %55 = vector.extract_strided_slice %14 {offsets = [0, 24], sizes = [8, 8], strides = [1, 1]} : vector<8x32xbf16> to vector<8x8xbf16>
    %c0_49 = arith.constant 0 : index
    %c3 = arith.constant 3 : index
    %c0_50 = arith.constant 0 : index
    %c0_51 = arith.constant 0 : index
    %56 = vector.load %arg7[%c0_49, %c3, %c0_50, %c0_51] : memref<1x4x8x8xbf16, #tpu.memory_space<vmem>>, vector<1x1x8x8xbf16>
    %57 = vector.shape_cast %56 : vector<1x1x8x8xbf16> to vector<8x8xbf16>
    %58 = vector.shape_cast %55 : vector<8x8xbf16> to vector<1x1x8x8xbf16>
    tpu.vector_store %arg7[%c0_49, %c3, %c0_50, %c0_51], %58 {strides = array<i32>} : memref<1x4x8x8xbf16, #tpu.memory_space<vmem>>, vector<1x1x8x8xbf16>,
    %59 = vector.extract_strided_slice %16 {offsets = [0, 24], sizes = [8, 8], strides = [1, 1]} : vector<8x32xbf16> to vector<8x8xbf16>
    %c0_52 = arith.constant 0 : index
    %c3_53 = arith.constant 3 : index
    %c0_54 = arith.constant 0 : index
    %c0_55 = arith.constant 0 : index
    %60 = vector.load %arg8[%c0_52, %c3_53, %c0_54, %c0_55] : memref<1x4x8x8xbf16, #tpu.memory_space<vmem>>, vector<1x1x8x8xbf16>
    %61 = vector.shape_cast %60 : vector<1x1x8x8xbf16> to vector<8x8xbf16>
    %62 = vector.shape_cast %59 : vector<8x8xbf16> to vector<1x1x8x8xbf16>
    tpu.vector_store %arg8[%c0_52, %c3_53, %c0_54, %c0_55], %62 {strides = array<i32>} : memref<1x4x8x8xbf16, #tpu.memory_space<vmem>>, vector<1x1x8x8xbf16>,
    %63 = vector.extract_strided_slice %18 {offsets = [0, 24], sizes = [8, 8], strides = [1, 1]} : vector<8x32xbf16> to vector<8x8xbf16>
    %c0_56 = arith.constant 0 : index
    %c3_57 = arith.constant 3 : index
    %c0_58 = arith.constant 0 : index
    %c0_59 = arith.constant 0 : index
    %64 = vector.load %arg9[%c0_56, %c3_57, %c0_58, %c0_59] : memref<1x4x8x8xbf16, #tpu.memory_space<vmem>>, vector<1x1x8x8xbf16>
    %65 = vector.shape_cast %64 : vector<1x1x8x8xbf16> to vector<8x8xbf16>
    %66 = vector.shape_cast %63 : vector<8x8xbf16> to vector<1x1x8x8xbf16>
    tpu.vector_store %arg9[%c0_56, %c3_57, %c0_58, %c0_59], %66 {strides = array<i32>} : memref<1x4x8x8xbf16, #tpu.memory_space<vmem>>, vector<1x1x8x8xbf16>,
    return
  }
  func.func @transform_0(%arg0: i32, %arg1: i32) -> (i32, i32, i32) {
    %c0_i32 = arith.constant 0 : i32
    %c0_i32_0 = arith.constant 0 : i32
    return %arg0, %arg1, %c0_i32 : i32, i32, i32
  }
  func.func @transform_1(%arg0: i32, %arg1: i32) -> (i32, i32, i32) {
    %c0_i32 = arith.constant 0 : i32
    %c0_i32_0 = arith.constant 0 : i32
    return %arg0, %arg1, %c0_i32 : i32, i32, i32
  }
  func.func @transform_2(%arg0: i32, %arg1: i32) -> (i32, i32, i32) {
    %c0_i32 = arith.constant 0 : i32
    %c0_i32_0 = arith.constant 0 : i32
    return %arg0, %arg1, %c0_i32 : i32, i32, i32
  }
  func.func @transform_3(%arg0: i32, %arg1: i32) -> (i32, i32) {
    %c0_i32 = arith.constant 0 : i32
    %c0_i32_0 = arith.constant 0 : i32
    %c0_i32_1 = arith.constant 0 : i32
    return %c0_i32, %c0_i32_0 : i32, i32
  }
  func.func @transform_4(%arg0: i32, %arg1: i32) -> (i32, i32) {
    %c0_i32 = arith.constant 0 : i32
    %c0_i32_0 = arith.constant 0 : i32
    %c0_i32_1 = arith.constant 0 : i32
    return %c0_i32, %c0_i32_0 : i32, i32
  }
  func.func @transform_5(%arg0: i32, %arg1: i32) -> (i32, i32, i32, i32) {
    %c0_i32 = arith.constant 0 : i32
    %c0_i32_0 = arith.constant 0 : i32
    %c0_i32_1 = arith.constant 0 : i32
    return %arg0, %c0_i32, %arg1, %c0_i32_0 : i32, i32, i32, i32
  }
  func.func @transform_6(%arg0: i32, %arg1: i32) -> (i32, i32, i32, i32) {
    %c0_i32 = arith.constant 0 : i32
    %c0_i32_0 = arith.constant 0 : i32
    %c0_i32_1 = arith.constant 0 : i32
    return %arg0, %c0_i32, %arg1, %c0_i32_0 : i32, i32, i32, i32
  }
  func.func @transform_7(%arg0: i32, %arg1: i32) -> (i32, i32, i32, i32) {
    %c0_i32 = arith.constant 0 : i32
    %c0_i32_0 = arith.constant 0 : i32
    %c0_i32_1 = arith.constant 0 : i32
    return %arg0, %c0_i32, %arg1, %c0_i32_0 : i32, i32, i32, i32
  }
}

</mosaic_0001>

<bundles_post_ra>
// kernel: tpu_custom_call.1
= control target key start
LH: loop header
LB: loop body
LE: loop exit
PB: predicated region body
PF: predicated region fallthrough
CT: control target
= control target key end

     0   :  { %s1688_s0 = inlined_call_operand.hbm [shape: f32[2,8,32], index: 0, kind: input, shape index: {}]   ;;  %s1689_s1 = inlined_call_operand.hbm [shape: f32[2,8,32], index: 1, kind: input, shape index: {}]   ;;  %s1690_s2 = inlined_call_operand.hbm [shape: f32[2,8,32], index: 2, kind: input, shape index: {}]   ;;  %s1691_s3 = inlined_call_operand.hbm [shape: bf16[32,32], index: 3, kind: input, shape index: {}]   ;;  %s1692_s4 = inlined_call_operand.hbm [shape: bf16[32,32], index: 4, kind: input, shape index: {}]   ;;  %s1693_s5 = inlined_call_operand.hbm [shape: bf16[2,4,8,8], index: 5, kind: output, shape index: {0}]   ;;  %s1694_s6 = inlined_call_operand.hbm [shape: bf16[2,4,8,8], index: 6, kind: output, shape index: {1}]   ;;  %s1695_s7 = inlined_call_operand.hbm [shape: bf16[2,4,8,8], index: 7, kind: output, shape index: {2}]  }
   0x1   :  { %1708 = sst [smem:[#allocation27_spill]] %s1689_s1 }
   0x2   :  { %1709 = sst [smem:[#allocation28_spill]] %s1691_s3 }
   0x3   :  { %1710 = sst [smem:[#allocation29_spill]] %s1692_s4 }
   0x4   :  { %1711 = sst [smem:[#allocation30_spill]] %s1693_s5 }
   0x5   :  { %1712 = sst [smem:[#allocation31_spill]] %s1695_s7 }
   0x6   :  { %13 = vsyncpa [#allocation3], 0 }
   0x7   :  { %15 = vsyncpa [#allocation3 + $0x1], 0 }
   0x8   :  { %16 = vsyncpa [#allocation6], 0 }
   0x9   :  { %18 = vsyncpa [#allocation6 + $0x1], 0 }
   0xa   :  { %19 = vsyncpa [#allocation9], 0 }
   0xb   :  { %20 = vsyncpa [#allocation4], 0 }
   0xc   :  { %22 = vsyncpa [#allocation4 + $0x1], 0 }
   0xd   :  { %23 = vsyncpa [#allocation13], 0 }
   0xe   :  { %25 = vsyncpa [#allocation13 + $0x1], 0  ;;  %s1399_s24 = smov 0   ;;  %s1401_s25 = smov 0  }
   0xf   :  { %s1403_s26 = smov 0   ;;  %s1405_s27 = smov 0  }
  0x10   :  { %s1407_s28 = smov 0   ;;  %s1409_s29 = smov 0  }
  0x11 LB: > { %1713 = sst [smem:[#allocation20_spill]] %s1328_s24  ;;  %s1430_s30 = sadd.s32 4294967295, %s1348_s29   ;;  %s1348_s29 = sphi %s1409_s29, %s31_s29   ;;  %s1344_s28 = sphi %s1407_s28, %s1742_s28   ;;  %s1340_s27 = sphi %s1405_s27, %s1741_s27   ;;  %s1336_s26 = sphi %s1403_s26, %s1740_s26   ;;  %s1332_s25 = sphi %s1401_s25, %s1744_s25   ;;  %s1328_s24 = sphi %s1399_s24, %s1743_s24  }
  0x12   : > { %1714 = sst [smem:[#allocation21_spill]] %s1336_s26  ;;  %p873_p0 = scmp.ge.s32.totalorder %s1348_s29, 1 }
  0x13   : > { %1715 = sst [smem:[#allocation22_spill]] %s1344_s28  ;;  %p66_p1 = scmp.eq.s32.totalorder %s1430_s30, 0 }
  0x14   : > { %1716 = sst [smem:[#allocation23_spill]] %s1348_s29  ;;  %p258_p2 = scmp.lt.s32.totalorder %s1348_s29, 3 }
  0x15   : > { %s1717_s3 = sld [smem:[#allocation28_spill]]  ;;  %s1350_s12 = smov [#allocation8]  }
  0x16   : > { %p1438_p3 = pnand %p873_p0, %p258_p2  ;;  %s271_s13 = sshll.u32 %s1350_s12, 4  ;;  %s272_s13 = int_to_ptr.vmem [resolvable:$true] %s271_s13 }
  0x17   : > { %s1697_s15 = smov 64   ;;  %s1698_s16 = smov 4  }
  0x18   : > { %p958_p4 = pneg %p1438_p3  ;;  %s1696_s17 = sadd.s32 4294967294, %s1348_s29  }
  0x19   : > { %s43_s18 = sadd.s32 1, %s1344_s28  ;;  %s52_s19 = sadd.s32 1, %s1336_s26 }
  0x1a   : > { %p1446_p5 = pnand %p958_p4, %p66_p1  ;;  %p45_p7 = scmp.ge.s32.totalorder %s43_s18, 2 }
  0x1b   : > { %s269_s10 = sshll.u32 %s1717_s3, 4  ;;  %p59_p8 = scmp.ne.s32.totalorder %s1336_s26, %s1332_s25  ;;  %s270_s10 = int_to_ptr.hbm [resolvable:$true] %s269_s10 }
  0x1c   : > { %961 = dma.hbm_to_vmem [thread:$0]  (!%p1446_p5), %s270_s10, 256, %s272_s13, [#allocation9], %s1697_s15, %s1697_s15, %s1698_s16  }
  0x1d   : > { %p60_p9 = scmp.eq.s32.totalorder %s1348_s29, 0  ;;  %p65_p10 = scmp.ne.s32.totalorder %s1332_s25, %s1328_s24 }
  0x1e   : > { %s1746_s18 = smov (%p45_p7, %s43_s18), 0  ;;  %p189_p13 = scmp.eq.s32.totalorder %s1430_s30, 1 }
  0x1f   : > { %1720 = sst [smem:[#allocation24_spill]] %s1746_s18  ;;  %p1466_p11 = por %p60_p9, %p59_p8 }
  0x20   : > { %p1472_p12 = por %p66_p1, %p65_p10  ;;  %s47_s22 = ssub.s32 %s1344_s28, %s1746_s18 }
  0x21   : > { %p50_p0 = scmp.eq.s32.totalorder %s47_s22, 0  ;;  %p195_p2 = scmp.eq.s32.totalorder %s1696_s17, 1 }
  0x22   : > { %p1481_p4 = por %p189_p13, %p59_p8  ;;  %p987_p7 = scmp.lt.s32.totalorder %s1348_s29, 2 }
  0x23   : > { %s1487_s8 = scalar_select %p50_p0, %s1336_s26, %s52_s19  }
  0x24   : > { %p1489_p9 = por %p195_p2, %p65_p10  ;;  %s299_s10 = sand.u32 1, %s1336_s26  }
  0x25   : > { %1724 = sst [smem:[#allocation25_spill]] %s1487_s8  ;;  %s1494_s12 = sshll.u32 %s299_s10, 3 }
  0x26   : > { %s1725_s9 = scalar_select %p1489_p9, 1, 0 }
  0x27   : > { %s878_s13 = sshll.u32 %s1344_s28, 3  ;;  %p1499_p6 = pnand %p987_p7, %p1466_p11 }
  0x28   : > { %1726 = sst [smem:[#allocation26_spill]] %s1725_s9  ;;  %s319_s17 = sand.u32 1, %s1348_s29  }
  0x29   : > { %s1728_s1 = sld [smem:[#allocation27_spill]]  ;;  %s323_s18 = scalar_lea.vmem [#allocation5], %s1494_s12 }
  0x2a   : > { %s332_s8 = sshll.u32 %s323_s18, 4  ;;  %s320_s28 = scalar_lea.sflag [#allocation6], %s319_s17  ;;  %s333_s8 = int_to_ptr.vmem [resolvable:$true] %s332_s8 }
  0x2b   : > { %s1729_s4 = sld [smem:[#allocation29_spill]]  ;;  %s1353_s29 = smov [#allocation10]  }
  0x2c   : > { %s285_s24 = sshll.u32 %s1353_s29, 4  ;;  %s1730_s15 = smov 4   ;;  %s286_s24 = int_to_ptr.vmem [resolvable:$true] %s285_s24 }
  0x2d   : > { %s308_s17 = scalar_lea.hbm %s1688_s0, %s878_s13  ;;  %s300_s26 = scalar_lea.sflag [#allocation3], %s299_s10 }
  0x2e   : > { %s348_s14 = scalar_lea.hbm %s1690_s2, %s878_s13  ;;  %s343_s5 = scalar_lea.vmem [#allocation7], %s1494_s12 }
  0x2f   : > { %s328_s16 = scalar_lea.hbm %s1728_s1, %s878_s13  ;;  %s352_s7 = sshll.u32 %s343_s5, 4  ;;  %s353_s7 = int_to_ptr.vmem [resolvable:$true] %s352_s7 }
  0x30   : > { %s330_s3 = sshll.u32 %s328_s16, 4  ;;  %s1731_s16 = smov 64   ;;  %s331_s3 = int_to_ptr.hbm [resolvable:$true] %s330_s3 }
  0x31   : > { %971 = dma.hbm_to_vmem [thread:$0]  (!%p1499_p6), %s331_s3, 128, %s333_s8, %s320_s28  }
  0x32   : > { %s283_s9 = sshll.u32 %s1729_s4, 4  ;;  %s310_s3 = sshll.u32 %s308_s17, 4  ;;  %s284_s9 = int_to_ptr.hbm [resolvable:$true] %s283_s9  ;;  %s311_s3 = int_to_ptr.hbm [resolvable:$true] %s310_s3 }
  0x33   : > { %964 = dma.hbm_to_vmem [thread:$0]  (!%p1446_p5), %s284_s9, 256, %s286_s24, [#allocation9], %s1731_s16, %s1731_s16, %s1730_s15  }
  0x34   : > { %s303_s8 = scalar_lea.vmem [#allocation2], %s1494_s12  ;;  %s350_s4 = sshll.u32 %s348_s14, 4  ;;  %s351_s4 = int_to_ptr.hbm [resolvable:$true] %s350_s4 }
  0x35   : > { %s312_s1 = sshll.u32 %s303_s8, 4  ;;  %361 = sbr.rel (%p1438_p3) target bundleno = 355 (0x163), region = 40  ;;  %s313_s1 = int_to_ptr.vmem [resolvable:$true] %s312_s1 }
  0x36   : > { %968 = dma.hbm_to_vmem [thread:$0]  (!%p1499_p6), %s311_s3, 128, %s313_s1, %s300_s26  }
  0x37   : > { %974 = dma.hbm_to_vmem [thread:$0]  (!%p1499_p6), %s351_s4, 128, %s353_s7, %s320_s28  }
  0x38   : > { %s1533_s24 = sand.u32 (!%p1438_p3), 1, %s1332_s25  }
  0x39   : > { %s884_s1 = sshll.u32 (!%p1438_p3), %s1533_s24, 3  ;;  %s364_s9 = scalar_lea.sflag (!%p1438_p3), [#allocation3], %s1533_s24 }
  0x3a   : > { %s367_s10 = scalar_lea.vmem [#allocation2], %s884_s1 }
  0x3b   : > { %1307 = dma.done.wait (%p1472_p12), %s364_s9, 128  }
  0x3c   : > { %1309 = vsyncadd (%p1472_p12), %s364_s9, 4294967168  ;;  %s373_s4 = sand.u32 1, %s1430_s30   ;;  %s377_s7 = scalar_lea.vmem [#allocation5], %s884_s1 }
  0x3d   : > { %s374_s5 = scalar_lea.sflag [#allocation6], %s373_s4 }
  0x3e   : > { %1311 = dma.done.wait (%p1472_p12), %s374_s5, 256  }
  0x3f   : > { %1313 = vsyncadd (%p1472_p12), %s374_s5, 4294967040  ;;  %s387_s28 = scalar_lea.vmem [#allocation7], %s884_s1 }
  0x40   : > { %1315 = dma.done.wait (%p66_p1), [#allocation9], 512  }
  0x41   : > { %1317 = vsyncadd (%p66_p1), [#allocation9], 4294966784  ;;  %v932_v0 = vld [vmem:[#allocation8 + $0x8] sm:$0xff]  ;;  %v934_v1 = vld [vmem:[#allocation10 + $0x8] sm:$0xff]  ;;  %vm476_vm0 = vcmask 261120   ;;  %s889_s11 = sshll.u32 %s1533_s24, 4 }
  0x42   : > { %v931_v2 = vld [vmem:[#allocation8] sm:$0xff]  ;;  %486 = vmatpush.bf16.msra.mxu0 %v932_v0  ;;  %516 = vmatpush.bf16.msra.mxu1 %v934_v1  ;;  %v933_v3 = vld [vmem:[#allocation10] sm:$0xff]  ;;  %vm541_vm1 = vcmask 60416   ;;  %s1553_s21 = scalar_lea.vmem [#allocation12], %s889_s11  ;;  %s1354_s12 = smov 104  }
  0x43   : > { %v450_v4 = vld [vmem:[%s367_s10] sm:$0xff]  ;;  %v452_v5 = vld [vmem:[%s377_s7] sm:$0xff]  ;;  %533 = vmatpush.bf16.msra.mxu2 %v932_v0  ;;  %s1355_s13 = smov 120   ;;  %s1557_s22 = scalar_lea.vmem [#allocation11], %s889_s11 }
  0x44   : > { %v454_v6 = vld [vmem:[%s387_s28] sm:$0xff]  ;;  %v451_v7 = vpack.c.bf16 %v450_v4, %v450_v4  ;;  %v453_v8 = vpack.c.bf16 %v452_v5, %v452_v5  ;;  %s1356_s15 = smov 112   ;;  %s1561_s16 = scalar_lea.vmem [#allocation14], %s889_s11 }
  0x45   : > { %v455_v9 = vpack.c.bf16 %v454_v6, %v454_v6  ;;  %s1572_s18 = sshll.u32 %s1340_s27, 4  ;;  %s635_s8 = sshll.u32 %s1553_s21, 4  ;;  %s636_s8 = int_to_ptr.vmem [resolvable:$true] %s635_s8 }
  0x46   : > { %487 = vmatpush.bf16.msra.mxu0 %v931_v2  ;;  %517 = vmatpush.bf16.msra.mxu1 %v933_v3  ;;  %s634_s3 = scalar_lea.hbm %s1694_s6, %s1572_s18  ;;  %s1732_s20 = sld [smem:[#allocation31_spill]] }
  0x47   : > { %534 = vmatpush.bf16.msra.mxu2 %v931_v2  ;;  %s1583_s26 = sshll.u32 %s634_s3, 4  ;;  %s1733_s10 = sld [smem:[#allocation30_spill]]  ;;  %s638_s26 = int_to_ptr.hbm [resolvable:$true] %s1583_s26 }
  0x48   : > { %s1600_s7 = scalar_lea.sflag [#allocation13], %s373_s4  ;;  %s1212_s28 = sshra.s32 %s638_s26, 4  ;;  %s1213_s28 = int_to_ptr.hbm [resolvable:$true] %s1212_s28 }
  0x49   : > { %900 = vmatmul.msk.bf16.vlgmr.msra.gmra.mxu0 %vm476_vm0, %v451_v7  ;;  %909 = vmatmul.msk.bf16.vlgmr.msra.gmra.mxu1 %vm476_vm0, %v453_v8  ;;  %s1214_s11 = scalar_lea.hbm %s1213_s28, 16  ;;  %p1219_p6 = scmp.lt.s32.totalorder %s1213_s28, %s1694_s6 }
  0x4a   : > { %910 = vmatmul.msk.bf16.vlgmr.msra.gmra.mxu2 %vm476_vm0, %v455_v9  ;;  %p1215_p1 = scmp.ne.s32.totalorder %s1213_s28, %s1214_s11 }
  0x4c   : > { %s652_s14 = scalar_lea.hbm %s1732_s20, %s1572_s18  ;;  %p1216_p3 = pnand %p1215_p1, %p1481_p4 }
  0x4d   : > { %s616_s5 = scalar_lea.hbm %s1733_s10, %s1572_s18 }
  0x4e   : > { %p1217_p5 = pneg %p1216_p3 }
  0xc6   : > { %v489_v10 = vpop.f32.mrf.mxu0  ;;  %v519_v11 = vpop.f32.mrf.mxu1 }
  0xc7   : > { %v493_v12 = vmul.f32 0.35355338, %v489_v10  ;;  %v523_v13 = vpack.c.bf16 %v519_v11, %v519_v11 }
  0xc9   : > { %v494_v14 = vpack.c.bf16 %v493_v12, %v493_v12  ;;  %543 = vst.msk [vmem:[%s1553_s21] sm:$0xf] %vm541_vm1, %v523_v13  ;;  %583 = vrot.lane.b32.xlu1 %v523_v13, %s1354_s12  ;;  %552 = vrot.lane.b32.xlu0 %v523_v13, %s1355_s13 }
  0xcb   : > { %542 = vst.msk [vmem:[%s1557_s22] sm:$0xf] %vm541_vm1, %v494_v14  ;;  %563 = vrot.lane.b32.xlu2 %v494_v14, %s1356_s15 }
  0xcd   : > { %v536_v15 = vpop.f32.mrf.mxu2 }
  0xce   : > { %v491_v16 = vpop.f32.mrf.mxu0  ;;  %v521_v17 = vpop.f32.mrf.mxu1  ;;  %v540_v18 = vpack.c.bf16 %v536_v15, %v536_v15 }
  0xd0   : > { %544 = vst.msk [vmem:[%s1561_s16] sm:$0xf] %vm541_vm1, %v540_v18 }
  0xd1   : > { %568 = vrot.lane.b32.xlu0 %v523_v13, %s1356_s15  ;;  %546 = vrot.lane.b32.xlu1 %v494_v14, %s1355_s13 }
  0xd3   : > { %558 = vrot.lane.b32.xlu2 %v540_v18, %s1355_s13  ;;  %s1218_s13 = scalar_lea.hbm %s1694_s6, 32 }
  0xd4   : > { %p1220_p8 = scmp.lt.s32.totalorder %s1218_s13, %s1214_s11 }
  0xd5   : > { %v538_v19 = vpop.f32.mrf.mxu2 }
  0xd6   : > { %p1221_p10 = por %p1220_p8, %p1219_p6 }
  0xd8   : > { %p1222_p11 = pnand %p1221_p10, %p1217_p5 }
  0xd9   : > { %573 = vrot.lane.b32.xlu0 %v540_v18, %s1356_s15  ;;  %578 = vrot.lane.b32.xlu1 %v494_v14, %s1354_s12 }
  0xdb   : > { %588 = vrot.lane.b32.xlu2 %v540_v18, %s1354_s12 }
 0x125   : > { %v564_v20 = vpop.permute.xlu2 %563 }
 0x126   : > { %914 = vst.msk [vmem:[%s1557_s22 + $0x8] sm:$0xf] %vm541_vm1, %v564_v20 }
 0x12d   : > { %v559_v21 = vpop.permute.xlu2 %558 }
 0x12e   : > { %913 = vst.msk [vmem:[%s1561_s16 + $0x4] sm:$0xf] %vm541_vm1, %v559_v21 }
 0x135   : > { %v589_v22 = vpop.permute.xlu2 %588 }
 0x136   : > { %919 = vst.msk [vmem:[%s1561_s16 + $0xc] sm:$0xf] %vm541_vm1, %v589_v22 }
 0x13b   : > { %v584_v23 = vpop.permute.xlu1 %583  ;;  %v553_v24 = vpop.permute.xlu0 %552 }
 0x13c   : > { %918 = vst.msk [vmem:[%s1553_s21 + $0xc] sm:$0xf] %vm541_vm1, %v584_v23 }
 0x13d   : > { %912 = vst.msk [vmem:[%s1553_s21 + $0x4] sm:$0xf] %vm541_vm1, %v553_v24 }
 0x143   : > { %v569_v25 = vpop.permute.xlu0 %568  ;;  %v547_v26 = vpop.permute.xlu1 %546 }
 0x144   : > { %915 = vst.msk [vmem:[%s1553_s21 + $0x8] sm:$0xf] %vm541_vm1, %v569_v25 }
 0x145   : > { %911 = vst.msk [vmem:[%s1557_s22 + $0x4] sm:$0xf] %vm541_vm1, %v547_v26 }
 0x146   : > { %1225 = shalt.err (!%p1222_p11)
}
 0x147   : > { %s1357_s30 = smov 64   ;;  %s1358_s4 = smov 4  }
 0x148   : > { %953 = dma.vmem_to_hbm [thread:$0]  (%p1481_p4), %s636_s8, 256, %s638_s26, %s1600_s7, %s1357_s30, %s1357_s30, %s1358_s4  }
 0x149   : > { %s617_s18 = sshll.u32 %s1557_s22, 4  ;;  %s1617_s17 = sshll.u32 %s616_s5, 4  ;;  %s618_s18 = int_to_ptr.vmem [resolvable:$true] %s617_s18  ;;  %s620_s17 = int_to_ptr.hbm [resolvable:$true] %s1617_s17 }
 0x14a   : > { %s653_s3 = sshll.u32 %s1561_s16, 4  ;;  %s1620_s27 = sshll.u32 %s652_s14, 4  ;;  %s1623_s3 = int_to_ptr.vmem [resolvable:$true] %s653_s3  ;;  %s656_s27 = int_to_ptr.hbm [resolvable:$true] %s1620_s27 }
 0x14b   : > { %v574_v27 = vpop.permute.xlu0 %573  ;;  %v579_v28 = vpop.permute.xlu1 %578  ;;  %s594_s8 = scalar_lea.sflag [#allocation4], %s1533_s24  ;;  %s1240_s26 = sshra.s32 %s620_s17, 4  ;;  %s1241_s26 = int_to_ptr.hbm [resolvable:$true] %s1240_s26 }
 0x14c   : > { %916 = vst.msk [vmem:[%s1561_s16 + $0x8] sm:$0xf] %vm541_vm1, %v574_v27  ;;  %s1242_s29 = scalar_lea.hbm %s1241_s26, 16  ;;  %s1246_s9 = scalar_lea.hbm %s1733_s10, 32 }
 0x14d   : > { %917 = vst.msk [vmem:[%s1557_s22 + $0xc] sm:$0xf] %vm541_vm1, %v579_v28  ;;  %p1243_p12 = scmp.ne.s32.totalorder %s1241_s26, %s1242_s29  ;;  %p1247_p2 = scmp.lt.s32.totalorder %s1241_s26, %s1733_s10 }
 0x14e   : > { %p1248_p7 = scmp.lt.s32.totalorder %s1246_s9, %s1242_s29 }
 0x14f   : > { %p1244_p13 = pnand %p1243_p12, %p1481_p4 }
 0x150   : > { %p1249_p1 = por %p1248_p7, %p1247_p2 }
 0x151   : > { %p1245_p0 = pneg %p1244_p13 }
 0x153   : > { %p1250_p3 = pnand %p1249_p1, %p1245_p0 }
 0x155   : > { %1253 = shalt.err (!%p1250_p3)
}
 0x156   : > { %952 = dma.vmem_to_hbm [thread:$0]  (%p1481_p4), %s618_s18, 256, %s620_s17, %s594_s8, %s1357_s30, %s1357_s30, %s1358_s4  }
 0x157   : > { %s1268_s24 = sshra.s32 %s656_s27, 4  ;;  %s1274_s21 = scalar_lea.hbm %s1732_s20, 32  ;;  %s1269_s24 = int_to_ptr.hbm [resolvable:$true] %s1268_s24 }
 0x158   : > { %s1270_s22 = scalar_lea.hbm %s1269_s24, 16  ;;  %p1275_p10 = scmp.lt.s32.totalorder %s1269_s24, %s1732_s20 }
 0x159   : > { %p1271_p5 = scmp.ne.s32.totalorder %s1269_s24, %s1270_s22  ;;  %p1276_p11 = scmp.lt.s32.totalorder %s1274_s21, %s1270_s22 }
 0x15b   : > { %p1272_p6 = pnand %p1271_p5, %p1481_p4  ;;  %p1277_p12 = por %p1276_p11, %p1275_p10 }
 0x15d   : > { %p1273_p8 = pneg %p1272_p6 }
 0x15f   : > { %p1278_p13 = pnand %p1277_p12, %p1273_p8 }
 0x161   : > { %1281 = shalt.err (!%p1278_p13)
}
 0x162   : > { %954 = dma.vmem_to_hbm [thread:$0]  (%p1481_p4), %s1623_s3, 256, %s656_s27, %s1600_s7, %s1357_s30, %s1357_s30, %s1358_s4  }
 0x163 PF: > { %s1734_s15 = sld [smem:[#allocation20_spill]] }
 0x164   : > { %s1736_s18 = sld [smem:[#allocation23_spill]] }
 0x169   : > { %s670_s17 = sand.u32 1, %s1734_s15  }
 0x16a   : > { %p1737_p0 = scmp.ge.s32.totalorder %s1736_s18, 2  ;;  %s671_s8 = scalar_lea.sflag [#allocation4], %s670_s17 }
 0x16c   : > { %p976_p2 = pnand %p1737_p0, %p1489_p9 }
 0x16e   : > { %p977_p7 = pneg %p976_p2 }
 0x170   : > { %1319 = dma.done.wait (%p977_p7), %s671_s8, 256  }
 0x171   : > { %1321 = vsyncadd (%p977_p7), %s671_s8, 4294967040  ;;  %s1738_s23 = sadd.s32 4294967294, %s1736_s18  }
 0x172   : > { %s680_s26 = sand.u32 1, %s1738_s23  }
 0x173   : > { %s681_s29 = scalar_lea.sflag [#allocation13], %s680_s26 }
 0x174   : > { %1323 = dma.done.wait (%p977_p7), %s681_s29, 512  }
 0x175   : > { %1325 = vsyncadd (%p977_p7), %s681_s29, 4294966784  ;;  %s31_s29 = sadd.s32 1, %s1736_s18   ;;  %s1739_s7 = sld [smem:[#allocation21_spill]] }
 0x176   : > { %p28_p4 = scmp.ge.s32.totalorder %s31_s29, 4   ;;  %s1740_s26 = sld [smem:[#allocation25_spill]] }
 0x177   : > { %s1741_s27 = sld [smem:[#allocation22_spill]]  ;;  %s1743_s24 = smov %s1332_s25 }
 0x178   : > { %s1742_s28 = sld [smem:[#allocation24_spill]]  ;;  %30 = sbr.rel (!%p28_p4) target bundleno = 17 (0x11), region = 158 }
 0x17b   : > { %s1744_s25 = smov %s1739_s7 }
 0x17d   :  { %697 = vsyncpa [#allocation3], 1 }
 0x17e   :  { %699 = vsyncpa [#allocation3 + $0x1], 1 }
 0x17f   :  { %700 = vsyncpa [#allocation6], 1 }
 0x180   :  { %702 = vsyncpa [#allocation6 + $0x1], 1 }
 0x181   :  { %703 = vsyncpa [#allocation9], 1 }
 0x182   :  { %704 = vsyncpa [#allocation4], 1 }
 0x183   :  { %706 = vsyncpa [#allocation4 + $0x1], 1 }
 0x184   :  { %707 = vsyncpa [#allocation13], 1 }
 0x185   :  { %709 = vsyncpa [#allocation13 + $0x1], 1 }

</bundles_post_ra>
